<compile_context>
chip_gen: v5e
topology: v5e:2x2
jax: 0.10.0
libtpu: 0.0.40
codegen_flags: <defaults>
</compile_context>

<pallas_src>
import functools

import jax
import jax.numpy as jnp
from jax.experimental import pallas as pl
from jax.experimental.pallas import tpu as pltpu

_HIDDEN_PAD = 128                    # fc1 out features 10 -> one full lane width
_OUT_W = 8                           # fc2 out features 5  -> rounded up to 8 lanes
_MAX_TILE_B = 4096                   # upper bound on rows per grid step
_VMEM_LIMIT_BYTES = 32 * 1024 * 1024  # explicit scoped-VMEM request (safe on v5e/v6e/v7x)
_VMEM_BUDGET_BYTES = 20 * 1024 * 1024  # working-set budget (headroom vs. the limit)


def _round_down_mult(n, m):
    return (n // m) * m


def mlp_kernel(x_ref, w1_ref, b1_ref, w2_ref, b2_ref, o_ref):
    # fc1: (tile_b, D) @ (D, 128) + (1, 128), ReLU — lane-dense compute.
    h = jnp.dot(x_ref[...], w1_ref[...], preferred_element_type=jnp.float32)
    h = jnp.maximum(h + b1_ref[...], 0.0)
    # fc2: (tile_b, 128) @ (128, 128); only the first 8 lanes are stored.
    y = jnp.dot(h, w2_ref[...], preferred_element_type=jnp.float32)
    o_ref[...] = (y[:, :_OUT_W] + b2_ref[...]).astype(o_ref.dtype)


def pack_params(w1, b1, w2, b2):
    """Pre-pack PyTorch-layout (out, in) weights into the kernel's lane-dense
    layout. Done ONCE at init time, not per forward call."""
    h_out, d = w1.shape          # (10, D)
    n_out = w2.shape[0]          # 5
    dtype = w1.dtype
    w1_p = jnp.zeros((d, _HIDDEN_PAD), dtype).at[:, :h_out].set(w1.T)
    b1_p = jnp.zeros((1, _HIDDEN_PAD), dtype).at[:, :h_out].set(b1)
    w2_p = jnp.zeros((_HIDDEN_PAD, _HIDDEN_PAD), dtype).at[:h_out, :n_out].set(w2.T)
    b2_p = jnp.zeros((1, _OUT_W), dtype).at[:, :n_out].set(b2)
    return w1_p, b1_p, w2_p, b2_p


def _pick_tile_b(B, D):
    """D-aware batch tile: per-row cost = double-buffered x + double-buffered
    8-wide out + 128-wide fc1 intermediate; resident weights are still
    double-buffered by the pipeline, so subtract them from the budget."""
    bytes_per_row = 4 * (2 * D + 2 * _OUT_W + _HIDDEN_PAD)
    weight_bytes = 4 * 2 * (D * _HIDDEN_PAD + _HIDDEN_PAD * _HIDDEN_PAD
                            + _HIDDEN_PAD + _OUT_W)
    avail = max(_VMEM_BUDGET_BYTES - weight_bytes, 8 * bytes_per_row)
    cap = min(_MAX_TILE_B, max(8, _round_down_mult(avail // bytes_per_row, 8)))
    if B <= cap:
        return B      # single block == full array dim (legal even if B % 8 != 0)
    return cap        # multiple of 8; last grid block may be partial (ragged)


@functools.partial(jax.jit, static_argnames=("n_out",))
def nn_forward(x, w1_p, b1_p, w2_p, b2_p, *, n_out=5):
    """Pallas equivalent of fc2(relu(fc1(x))) on pre-packed params."""
    B, D = x.shape
    dtype = x.dtype
    tile_b = _pick_tile_b(B, D)
    grid = (pl.cdiv(B, tile_b),)

    cost = pl.CostEstimate(
        flops=2 * B * D * _HIDDEN_PAD + 2 * B * _HIDDEN_PAD * _HIDDEN_PAD,
        transcendentals=0,
        bytes_accessed=4 * (B * D + B * _OUT_W + D * _HIDDEN_PAD
                            + _HIDDEN_PAD * _HIDDEN_PAD + _HIDDEN_PAD + _OUT_W),
    )

    out = pl.pallas_call(
        mlp_kernel,
        out_shape=jax.ShapeDtypeStruct((B, _OUT_W), dtype),
        grid=grid,
        in_specs=[
            pl.BlockSpec((tile_b, D), lambda i: (i, 0)),                 # x: tiled over batch
            pl.BlockSpec((D, _HIDDEN_PAD), lambda i: (0, 0)),            # w1: VMEM-resident
            pl.BlockSpec((1, _HIDDEN_PAD), lambda i: (0, 0)),            # b1: VMEM-resident
            pl.BlockSpec((_HIDDEN_PAD, _HIDDEN_PAD), lambda i: (0, 0)),  # w2: VMEM-resident
            pl.BlockSpec((1, _OUT_W), lambda i: (0, 0)),                 # b2: VMEM-resident
        ],
        out_specs=pl.BlockSpec((tile_b, _OUT_W), lambda i: (i, 0)),
        compiler_params=pltpu.CompilerParams(
            dimension_semantics=("parallel",),       # batch tiles shard across v7x TCs
            vmem_limit_bytes=_VMEM_LIMIT_BYTES,
        ),
        cost_estimate=cost,
    )(x, w1_p, b1_p, w2_p, b2_p)

    # Strip the 5 -> 8 lane rounding (32 B/row re-read, negligible).
    return out[:, :n_out]


def init_params(key, dim):
    """Deterministic init mimicking PyTorch nn.Linear (uniform +/- 1/sqrt(fan_in))."""
    k1, k2, k3, k4 = jax.random.split(key, 4)
    bound1 = 1.0 / jnp.sqrt(dim)
    w1 = jax.random.uniform(k1, (10, dim), jnp.float32, -bound1, bound1)
    b1 = jax.random.uniform(k2, (10,), jnp.float32, -bound1, bound1)
    bound2 = 1.0 / jnp.sqrt(10.0)
    w2 = jax.random.uniform(k3, (5, 10), jnp.float32, -bound2, bound2)
    b2 = jax.random.uniform(k4, (5,), jnp.float32, -bound2, bound2)
    return w1, b1, w2, b2


def _ref(x, w1, b1, w2, b2):
    return jnp.maximum(x @ w1.T + b1, 0.0) @ w2.T + b2


if __name__ == "__main__":
    key = jax.random.PRNGKey(0)
    kx, kp, kx2, kx3 = jax.random.split(key, 4)

    batch, dim = 8, 32
    w1, b1, w2, b2 = init_params(kp, dim)
    packed = pack_params(w1, b1, w2, b2)   # pack once, off the hot path

    # Small shape (single full block).
    x = jax.random.normal(kx, (batch, dim), jnp.float32)
    out = jax.block_until_ready(nn_forward(x, *packed))
    assert out.shape == (batch, 5)
    assert jnp.allclose(out, _ref(x, w1, b1, w2, b2), atol=1e-5, rtol=1e-5)

    # Non-multiple-of-8 batch: single full-extent (ragged) block, no x copy.
    x2 = jax.random.normal(kx2, (1000, dim), jnp.float32)
    out2 = jax.block_until_ready(nn_forward(x2, *packed))
    assert out2.shape == (1000, 5)
    assert jnp.allclose(out2, _ref(x2, w1, b1, w2, b2), atol=1e-5, rtol=1e-5)

    # Multi-step grid with a partial last block (exercises the tiled pipeline).
    x3 = jax.random.normal(kx3, (5000, dim), jnp.float32)
    out3 = jax.block_until_ready(nn_forward(x3, *packed))
    assert out3.shape == (5000, 5)
    assert jnp.allclose(out3, _ref(x3, w1, b1, w2, b2), atol=1e-5, rtol=1e-5)

    print("KERNEL_OK")
</pallas_src>

<mosaic_0001>
module attributes {stable_mosaic.version = 11 : i64} {
  func.func @mlp_kernel(%arg0: i32, %arg1: memref<8x32xf32, #tpu.memory_space<vmem>>, %arg2: memref<32x128xf32, #tpu.memory_space<vmem>>, %arg3: memref<1x128xf32, #tpu.memory_space<vmem>>, %arg4: memref<128x128xf32, #tpu.memory_space<vmem>>, %arg5: memref<1x8xf32, #tpu.memory_space<vmem>>, %arg6: memref<8x8xf32, #tpu.memory_space<vmem>>) attributes {dimension_semantics = [#tpu.dimension_semantics<parallel>], iteration_bounds = array<i64: 1>, scalar_prefetch = 0 : i64, scratch_operands = 0 : i64, tpu.core_type = #tpu.core_type<tc>, window_params = [{transform_indices = @transform_0, window_bounds = array<i64: 8, 32>}, {pipeline_mode = #tpu.pipeline_mode<synchronous>, transform_indices = @transform_1, window_bounds = array<i64: 32, 128>}, {pipeline_mode = #tpu.pipeline_mode<synchronous>, transform_indices = @transform_2, window_bounds = array<i64: 1, 128>}, {pipeline_mode = #tpu.pipeline_mode<synchronous>, transform_indices = @transform_3, window_bounds = array<i64: 128, 128>}, {pipeline_mode = #tpu.pipeline_mode<synchronous>, transform_indices = @transform_4, window_bounds = array<i64: 1, 8>}, {transform_indices = @transform_5, window_bounds = array<i64: 8, 8>}]} {
    %c0 = arith.constant 0 : index
    %c0_0 = arith.constant 0 : index
    %0 = vector.load %arg1[%c0, %c0_0] : memref<8x32xf32, #tpu.memory_space<vmem>>, vector<8x32xf32>
    %c0_1 = arith.constant 0 : index
    %c0_2 = arith.constant 0 : index
    %1 = vector.load %arg2[%c0_1, %c0_2] : memref<32x128xf32, #tpu.memory_space<vmem>>, vector<32x128xf32>
    %cst = arith.constant dense<0.000000e+00> : vector<8x128xf32>
    %2 = tpu.matmul %0, %1, %cst {dimension_numbers = #tpu.dot_dimension_numbers<[1], [0], [0], [1], [0, 0, 1, 1], [], []>} : vector<8x32xf32>, vector<32x128xf32>, vector<8x128xf32> -> vector<8x128xf32>
    %c0_3 = arith.constant 0 : index
    %c0_4 = arith.constant 0 : index
    %3 = vector.load %arg3[%c0_3, %c0_4] : memref<1x128xf32, #tpu.memory_space<vmem>>, vector<1x128xf32>
    %4 = vector.broadcast %3 : vector<1x128xf32> to vector<8x128xf32>
    %5 = arith.addf %2, %4 : vector<8x128xf32>
    %cst_5 = arith.constant 0.000000e+00 : f32
    %6 = vector.broadcast %cst_5 : f32 to vector<8x128xf32>
    %7 = arith.maximumf %5, %6 : vector<8x128xf32>
    %c0_6 = arith.constant 0 : index
    %c0_7 = arith.constant 0 : index
    %8 = vector.load %arg4[%c0_6, %c0_7] : memref<128x128xf32, #tpu.memory_space<vmem>>, vector<128x128xf32>
    %cst_8 = arith.constant dense<0.000000e+00> : vector<8x128xf32>
    %9 = tpu.matmul %7, %8, %cst_8 {dimension_numbers = #tpu.dot_dimension_numbers<[1], [0], [0], [1], [0, 0, 1, 1], [], []>} : vector<8x128xf32>, vector<128x128xf32>, vector<8x128xf32> -> vector<8x128xf32>
    %10 = vector.extract_strided_slice %9 {offsets = [0, 0], sizes = [8, 8], strides = [1, 1]} : vector<8x128xf32> to vector<8x8xf32>
    %c0_9 = arith.constant 0 : index
    %c0_10 = arith.constant 0 : index
    %11 = vector.load %arg5[%c0_9, %c0_10] : memref<1x8xf32, #tpu.memory_space<vmem>>, vector<1x8xf32>
    %12 = vector.broadcast %11 : vector<1x8xf32> to vector<8x8xf32>
    %13 = arith.addf %10, %12 : vector<8x8xf32>
    %c0_11 = arith.constant 0 : index
    %c0_12 = arith.constant 0 : index
    %14 = vector.load %arg6[%c0_11, %c0_12] : memref<8x8xf32, #tpu.memory_space<vmem>>, vector<8x8xf32>
    tpu.vector_store %arg6[%c0_11, %c0_12], %13 {strides = array<i32>} : memref<8x8xf32, #tpu.memory_space<vmem>>, vector<8x8xf32>,
    return
  }
  func.func @transform_0(%arg0: i32) -> (i32, i32) {
    %c0_i32 = arith.constant 0 : i32
    %c0_i32_0 = arith.constant 0 : i32
    return %arg0, %c0_i32 : i32, i32
  }
  func.func @transform_1(%arg0: i32) -> (i32, i32) {
    %c0_i32 = arith.constant 0 : i32
    %c0_i32_0 = arith.constant 0 : i32
    %c0_i32_1 = arith.constant 0 : i32
    return %c0_i32, %c0_i32_0 : i32, i32
  }
  func.func @transform_2(%arg0: i32) -> (i32, i32) {
    %c0_i32 = arith.constant 0 : i32
    %c0_i32_0 = arith.constant 0 : i32
    %c0_i32_1 = arith.constant 0 : i32
    return %c0_i32, %c0_i32_0 : i32, i32
  }
  func.func @transform_3(%arg0: i32) -> (i32, i32) {
    %c0_i32 = arith.constant 0 : i32
    %c0_i32_0 = arith.constant 0 : i32
    %c0_i32_1 = arith.constant 0 : i32
    return %c0_i32, %c0_i32_0 : i32, i32
  }
  func.func @transform_4(%arg0: i32) -> (i32, i32) {
    %c0_i32 = arith.constant 0 : i32
    %c0_i32_0 = arith.constant 0 : i32
    %c0_i32_1 = arith.constant 0 : i32
    return %c0_i32, %c0_i32_0 : i32, i32
  }
  func.func @transform_5(%arg0: i32) -> (i32, i32) {
    %c0_i32 = arith.constant 0 : i32
    %c0_i32_0 = arith.constant 0 : i32
    return %arg0, %c0_i32 : i32, i32
  }
}

</mosaic_0001>

<bundles_post_ra>
// kernel: nn_forward.1
= control target key start
LH: loop header
LB: loop body
LE: loop exit
PB: predicated region body
PF: predicated region fallthrough
CT: control target
= control target key end

     0   :  { %10 = vsyncpa [#allocation3], 0  ;;  %s326_s0 = inlined_call_operand.hbm [shape: f32[8,32], index: 0, kind: input, shape index: {}]   ;;  %s327_s1 = inlined_call_operand.hbm [shape: f32[32,128], index: 1, kind: input, shape index: {}]   ;;  %s328_s2 = inlined_call_operand.vmem [shape: f32[1,128], index: 2, kind: input, shape index: {}]   ;;  %s329_s3 = inlined_call_operand.hbm [shape: f32[128,128], index: 3, kind: input, shape index: {}]   ;;  %s330_s4 = inlined_call_operand.vmem [shape: f32[1,8], index: 4, kind: input, shape index: {}]   ;;  %s331_s5 = inlined_call_operand.hbm [shape: f32[8,8], index: 5, kind: output, shape index: {}]  }
   0x1   :  { %11 = vsyncpa [#allocation6], 0  ;;  %s28_s20 = sshll.u32 %s327_s1, 4  ;;  %s29_s20 = int_to_ptr.hbm [resolvable:$true] %s28_s20 }
   0x2   :  { %12 = vsyncpa [#allocation4], 0  ;;  %s272_s21 = smov [#allocation5]   ;;  %s18_s25 = sshll.u32 %s326_s0, 4  ;;  %s19_s25 = int_to_ptr.hbm [resolvable:$true] %s18_s25 }
   0x3   :  { %s30_s22 = sshll.u32 %s272_s21, 4  ;;  %s273_s26 = smov 128   ;;  %s31_s22 = int_to_ptr.vmem [resolvable:$true] %s30_s22 }
   0x4   :  { %s274_s27 = smov 8   ;;  %s275_s28 = smov [#allocation2]  }
   0x5   :  { %36 = dma.hbm_to_vmem [thread:$0]  %s29_s20, 512, %s31_s22, [#allocation6], %s273_s26, %s273_s26, %s274_s27  }
   0x6   :  { %s20_s29 = sshll.u32 %s275_s28, 4  ;;  %s43_s7 = sshll.u32 %s329_s3, 4  ;;  %s21_s29 = int_to_ptr.vmem [resolvable:$true] %s20_s29  ;;  %s44_s7 = int_to_ptr.hbm [resolvable:$true] %s43_s7 }
   0x7   :  { %23 = dma.hbm_to_vmem [thread:$0]  %s19_s25, 128, %s21_s29, [#allocation3]  }
   0x8   :  { %s276_s1 = smov [#allocation7]  }
   0x9   :  { %s45_s8 = sshll.u32 %s276_s1, 4  ;;  %s46_s8 = int_to_ptr.vmem [resolvable:$true] %s45_s8 }
   0xa   :  { %51 = dma.hbm_to_vmem [thread:$0]  %s44_s7, 2048, %s46_s8, [#allocation6], %s273_s26, %s273_s26, %s274_s27  }
   0xb   :  { %266 = dma.done.wait [#allocation3], 128  }
   0xc   :  { %267 = vsyncadd [#allocation3], 4294967168 }
   0xd   :  { %268 = dma.done.wait [#allocation6], 2560  }
   0xe   :  { %269 = vsyncadd [#allocation6], 4294964736  ;;  %v70_v0 = vld [vmem:[#allocation5 + $0x18] sm:$0xff]  ;;  %v69_v1 = vld [vmem:[#allocation5 + $0x10] sm:$0xff]  ;;  %vm75_vm0 = vcmask 261120   ;;  %s277_s11 = smov [#allocation8]  }
   0xf   :  { %91 = vmatpush.msra.mxu0 %v70_v0  ;;  %v115_v2 = vld [vmem:[#allocation7 + $0x78] sm:$0xff]  ;;  %v68_v3 = vld [vmem:[#allocation5 + $0x8] sm:$0xff]  ;;  %v114_v4 = vld [vmem:[#allocation7 + $0x70] sm:$0xff]  ;;  %s148_s12 = sshll.u32 %s277_s11, 4  ;;  %s150_s15 = sshll.u32 %s331_s5, 4  ;;  %vm141_vm1 = vcmask 64512   ;;  %s149_s12 = int_to_ptr.vmem [resolvable:$true] %s148_s12  ;;  %s151_s15 = int_to_ptr.hbm [resolvable:$true] %s150_s15 }
  0x10   :  { %116 = vmatpush.msra.mxu1 %v115_v2  ;;  %v113_v5 = vld [vmem:[#allocation7 + $0x68] sm:$0xff]  ;;  %v67_v6 = vld [vmem:[#allocation5] sm:$0xff]  ;;  %v66_v7 = vld [vmem:[#allocation2] sm:$0xff] }
  0x11   :  { %92 = vmatpush.msra.mxu0 %v69_v1  ;;  %v112_v8 = vld [vmem:[#allocation7 + $0x60] sm:$0xff]  ;;  %v111_v9 = vld [vmem:[#allocation7 + $0x58] sm:$0xff]  ;;  %v110_v10 = vld [vmem:[#allocation7 + $0x50] sm:$0xff] }
  0x12   :  { %117 = vmatpush.msra.mxu1 %v114_v4  ;;  %v109_v11 = vld [vmem:[#allocation7 + $0x48] sm:$0xff]  ;;  %v108_v12 = vld [vmem:[#allocation7 + $0x40] sm:$0xff]  ;;  %v107_v13 = vld [vmem:[#allocation7 + $0x38] sm:$0xff] }
  0x13   :  { %93 = vmatpush.msra.mxu0 %v68_v3  ;;  %v106_v14 = vld [vmem:[#allocation7 + $0x30] sm:$0xff]  ;;  %v105_v15 = vld [vmem:[#allocation7 + $0x28] sm:$0xff]  ;;  %v104_v16 = vld [vmem:[#allocation7 + $0x20] sm:$0xff] }
  0x14   :  { %118 = vmatpush.msra.mxu1 %v113_v5  ;;  %v103_v17 = vld [vmem:[#allocation7 + $0x18] sm:$0xff]  ;;  %v102_v18 = vld [vmem:[#allocation7 + $0x10] sm:$0xff]  ;;  %v101_v19 = vld [vmem:[#allocation7 + $0x8] sm:$0xff] }
  0x15   :  { %94 = vmatpush.msra.mxu0 %v67_v6  ;;  %v100_v20 = vld [vmem:[#allocation7] sm:$0xff]  ;;  %v168_v21 = vld [vmem:[%s328_s2] ss:$0 sm:$0xff] }
  0x16   :  { %161 = vmatmul.msk.f32.vlgmr.msra.gmra.mxu0 %vm75_vm0, %v66_v7  ;;  %119 = vmatpush.msra.mxu1 %v112_v8  ;;  %v169_v25 = vld [vmem:[%s330_s4] ss:$0 sm:$0xff] }
  0x18   :  { %120 = vmatpush.msra.mxu1 %v111_v9 }
  0x1a   :  { %121 = vmatpush.msra.mxu1 %v110_v10 }
  0x1c   :  { %122 = vmatpush.msra.mxu1 %v109_v11 }
  0x1e   :  { %123 = vmatpush.msra.mxu1 %v108_v12 }
  0x20   :  { %124 = vmatpush.msra.mxu1 %v107_v13 }
  0x22   :  { %125 = vmatpush.msra.mxu1 %v106_v14 }
  0x24   :  { %126 = vmatpush.msra.mxu1 %v105_v15 }
  0x26   :  { %127 = vmatpush.msra.mxu1 %v104_v16 }
  0x28   :  { %128 = vmatpush.msra.mxu1 %v103_v17 }
  0x2a   :  { %129 = vmatpush.msra.mxu1 %v102_v18 }
  0x2c   :  { %130 = vmatpush.msra.mxu1 %v101_v19 }
  0x2e   :  { %131 = vmatpush.msra.mxu1 %v100_v20 }
  0x93   :  { %v96_v22 = vpop.f32.mrf.mxu0 }
  0x94   :  { %v97_v23 = vadd.f32 %v168_v21, %v96_v22 }
  0x96   :  { %v99_v24 = vmax.f32 %v97_v23, 0.0 }
  0x98   :  { %132 = vmatmul.f32.vlgmr.msra.gmra.mxu1 %v99_v24 }
 0x115   :  { %v133_v26 = vpop.f32.mrf.mxu1 }
 0x116   :  { %v140_v27 = vadd.f32 %v169_v25, %v133_v26 }
 0x118   :  { %142 = vst.msk [vmem:[#allocation8] sm:$0xff] %vm141_vm1, %v140_v27 }
 0x119   :  { %153 = dma.vmem_to_hbm [thread:$0]  %s149_s12, 128, %s151_s15, [#allocation4]  }
 0x11a   :  { %270 = dma.done.wait [#allocation4], 128  }
 0x11b   :  { %271 = vsyncadd [#allocation4], 4294967168 }
 0x11c   :  { %158 = vsyncpa [#allocation3], 1 }
 0x11d   :  { %159 = vsyncpa [#allocation6], 1 }
 0x11e   :  { %160 = vsyncpa [#allocation4], 1 }

</bundles_post_ra>
